<compile_context>
chip_gen: v6e
topology: v6e:2x2x1
jax: 0.10.0
libtpu: 0.0.40
codegen_flags: <defaults>
</compile_context>

<pallas_src>
import functools

import jax
import jax.numpy as jnp
from jax.experimental import pallas as pl
from jax.experimental.pallas import tpu as pltpu


CLIP_VALUE = 5.0
ALPHA = 0.01

# Budget for the double-buffered feature tile (2 * TILE_N * D * itemsize) and
# explicit scoped-VMEM limit, chosen to be safe on v5e / v6e / v7x.
_X_TILE_VMEM_BUDGET = 16 * 1024 * 1024
_VMEM_LIMIT_BYTES = 32 * 1024 * 1024
_MAX_TILE_N = 2048


def _round_up(a, b):
    return (a + b - 1) // b * b


def _pick_tile_n(n, d, itemsize):
    """Largest row tile (multiple of 8, <= 2048) whose double buffer fits the budget."""
    n8 = _round_up(max(n, 1), 8)
    cap = max(8, (_X_TILE_VMEM_BUDGET // (2 * d * itemsize)) // 8 * 8)
    return min(_MAX_TILE_N, n8, cap)


# ----------------------------------------------------------------------------
# Kernels
# ----------------------------------------------------------------------------
def _reward_err_kernel(x_ref, w_ref, b_ref, gt_ref, baseline_ref,
                       err_ref, new_b_ref, acc_ref,
                       *, n_valid, tile_n, alpha):
    """Pass 1: err per tile + global sum(err) -> EMA baseline (sequential grid)."""
    i = pl.program_id(0)

    @pl.when(i == 0)
    def _():
        acc_ref[0] = 0.0

    # Reward head: Linear(D, 1).  (TILE_N, D) @ (D, 1) -> (TILE_N, 1), f32 acc.
    pred = jnp.dot(x_ref[...], w_ref[...],
                   preferred_element_type=jnp.float32) + b_ref[0]
    err = pred - gt_ref[...]
    err_ref[...] = err

    # Global (masked) running sum for the EMA baseline; padded rows excluded.
    row = i * tile_n + jax.lax.broadcasted_iota(jnp.int32, err.shape, 0)
    acc_ref[0] += jnp.sum(jnp.where(row < n_valid, err, 0.0))
    # Running EMA value; the value written on the last grid step is final.
    new_b_ref[0] = alpha * (acc_ref[0] / n_valid) + (1.0 - alpha) * baseline_ref[0]


def _reward_finalize_kernel(err_ref, new_b_ref, out_ref, *, clip_value):
    """Pass 2 (featherweight, parallel): center by baseline, clip, abs."""
    e = err_ref[...] - new_b_ref[0]
    out_ref[...] = jnp.abs(jnp.clip(e, -clip_value, clip_value))


def _reward_clip_kernel(x_ref, w_ref, b_ref, out_ref, *, clip_value):
    """No-ground-truth branch: clip(predicted_reward)."""
    pred = jnp.dot(x_ref[...], w_ref[...],
                   preferred_element_type=jnp.float32) + b_ref[0]
    out_ref[...] = jnp.clip(pred, -clip_value, clip_value)


# ----------------------------------------------------------------------------
# Wrapper
# ----------------------------------------------------------------------------
def reward_objective(imagined_features, head_w, head_b, baseline,
                     ground_truth_reward=None, *,
                     clip_value=CLIP_VALUE, alpha=ALPHA):
    """
    imagined_features: (B, T, D) float32 or bfloat16 (kept in native dtype)
    head_w:            (D, 1)   reward-head weight
    head_b:            (1,)     reward-head bias
    baseline:          (1,)     EMA baseline buffer
    ground_truth_reward: (B, T) or None

    Returns (intrinsic_reward (B, T), new_baseline (1,)) if gt is given,
    else intrinsic_reward (B, T).
    """
    B, T, D = imagined_features.shape
    N = B * T

    # Keep feature dtype as-is: bf16 halves HBM traffic (the binding resource).
    x = imagined_features.reshape(N, D)
    itemsize = x.dtype.itemsize
    w = head_w.reshape(D, 1).astype(x.dtype)
    b = jnp.asarray(head_b, jnp.float32).reshape(1)
    baseline = jnp.asarray(baseline, jnp.float32).reshape(1)

    tile_n = _pick_tile_n(N, D, itemsize)
    n_pad = _round_up(N, tile_n)
    grid = (n_pad // tile_n,)
    if n_pad != N:
        x = jnp.pad(x, ((0, n_pad - N), (0, 0)))

    x_spec = pl.BlockSpec((tile_n, D), lambda i: (i, 0))
    w_spec = pl.BlockSpec((D, 1), lambda i: (0, 0))            # resident
    col_spec = pl.BlockSpec((tile_n, 1), lambda i: (i, 0))
    smem_spec = pl.BlockSpec((1,), lambda i: (0,), memory_space=pltpu.SMEM)

    cost = pl.CostEstimate(
        flops=2 * n_pad * D,
        transcendentals=0,
        bytes_accessed=n_pad * D * itemsize + 3 * n_pad * 4)

    if ground_truth_reward is not None:
        gt = ground_truth_reward.reshape(N, 1).astype(jnp.float32)
        if n_pad != N:
            gt = jnp.pad(gt, ((0, n_pad - N), (0, 0)))

        # ---- Pass 1: heavy pass, reads x exactly once. Sequential grid
        # ("arbitrary") because the SMEM sum accumulator is carried across it.
        err, new_baseline = pl.pallas_call(
            functools.partial(_reward_err_kernel,
                              n_valid=N, tile_n=tile_n, alpha=alpha),
            grid=grid,
            in_specs=[x_spec, w_spec, smem_spec, col_spec, smem_spec],
            out_specs=(col_spec, smem_spec),
            out_shape=(jax.ShapeDtypeStruct((n_pad, 1), jnp.float32),
                       jax.ShapeDtypeStruct((1,), jnp.float32)),
            scratch_shapes=[pltpu.SMEM((1,), jnp.float32)],
            compiler_params=pltpu.CompilerParams(
                dimension_semantics=("arbitrary",),
                vmem_limit_bytes=_VMEM_LIMIT_BYTES),
            cost_estimate=cost,
        )(x, w, b, gt, baseline)

        # ---- Pass 2: touches only ~8*N bytes; trivially parallel.
        intrinsic = pl.pallas_call(
            functools.partial(_reward_finalize_kernel, clip_value=clip_value),
            grid=grid,
            in_specs=[col_spec, smem_spec],
            out_specs=col_spec,
            out_shape=jax.ShapeDtypeStruct((n_pad, 1), jnp.float32),
            compiler_params=pltpu.CompilerParams(
                dimension_semantics=("parallel",),
                vmem_limit_bytes=_VMEM_LIMIT_BYTES),
        )(err, new_baseline)

        return intrinsic[:N, 0].reshape(B, T), new_baseline

    # ---- No ground truth: single parallel pass.
    intrinsic = pl.pallas_call(
        functools.partial(_reward_clip_kernel, clip_value=clip_value),
        grid=grid,
        in_specs=[x_spec, w_spec, smem_spec],
        out_specs=col_spec,
        out_shape=jax.ShapeDtypeStruct((n_pad, 1), jnp.float32),
        compiler_params=pltpu.CompilerParams(
            dimension_semantics=("parallel",),
            vmem_limit_bytes=_VMEM_LIMIT_BYTES),
        cost_estimate=cost,
    )(x, w, b)
    return intrinsic[:N, 0].reshape(B, T)


# ----------------------------------------------------------------------------
# Pure-JAX reference
# ----------------------------------------------------------------------------
def reward_objective_ref(imagined_features, head_w, head_b, baseline,
                         ground_truth_reward=None, *,
                         clip_value=CLIP_VALUE, alpha=ALPHA):
    B, T, D = imagined_features.shape
    x = imagined_features.reshape(B * T, D).astype(jnp.float32)
    w = head_w.reshape(D, 1).astype(jnp.float32)
    pred = (x @ w + head_b.astype(jnp.float32)).reshape(B, T)
    if ground_truth_reward is None:
        return jnp.clip(pred, -clip_value, clip_value)
    err = pred - ground_truth_reward.astype(jnp.float32)
    base0 = jnp.asarray(baseline, jnp.float32).reshape(1)[0]
    new_b = alpha * err.mean() + (1.0 - alpha) * base0
    e = jnp.clip(err - new_b, -clip_value, clip_value)
    return jnp.abs(e), new_b


if __name__ == "__main__":
    key = jax.random.PRNGKey(0)
    k1, k2, k3, k4 = jax.random.split(key, 4)

    B, T, D = 2, 8, 32
    feats = jax.random.normal(k1, (B, T, D), dtype=jnp.float32)
    gt = jax.random.normal(k2, (B, T), dtype=jnp.float32)
    head_w = jax.random.normal(k3, (D, 1), dtype=jnp.float32) / jnp.sqrt(D)
    head_b = jax.random.normal(k4, (1,), dtype=jnp.float32) * 0.01
    baseline = jnp.zeros((1,), dtype=jnp.float32)

    # 1) Main path: f32 features with ground truth.
    intrinsic, new_baseline = reward_objective(feats, head_w, head_b, baseline, gt)
    jax.block_until_ready((intrinsic, new_baseline))
    ref_out, ref_b = reward_objective_ref(feats, head_w, head_b, baseline, gt)
    assert intrinsic.shape == (B, T)
    assert jnp.allclose(intrinsic, ref_out, atol=1e-4, rtol=1e-4)
    assert jnp.allclose(new_baseline[0], ref_b, atol=1e-4, rtol=1e-4)

    # 2) Ragged N (exercises padding + masked global-mean path).
    B2, T2 = 3, 7
    feats2 = jax.random.normal(k1, (B2, T2, D), dtype=jnp.float32)
    gt2 = jax.random.normal(k2, (B2, T2), dtype=jnp.float32)
    intr2, nb2 = reward_objective(feats2, head_w, head_b, baseline, gt2)
    ref2, refb2 = reward_objective_ref(feats2, head_w, head_b, baseline, gt2)
    assert jnp.allclose(intr2, ref2, atol=1e-4, rtol=1e-4)
    assert jnp.allclose(nb2[0], refb2, atol=1e-4, rtol=1e-4)

    # 3) bf16 feature path (no up-cast in the wrapper; MXU accumulates in f32).
    feats_bf = feats.astype(jnp.bfloat16)
    w_bf = head_w.astype(jnp.bfloat16)
    intr3, nb3 = reward_objective(feats_bf, w_bf, head_b, baseline, gt)
    ref3, refb3 = reward_objective_ref(feats_bf, w_bf, head_b, baseline, gt)
    assert jnp.allclose(intr3, ref3, atol=5e-3, rtol=5e-3)
    assert jnp.allclose(nb3[0], refb3, atol=5e-3, rtol=5e-3)

    # 4) No-ground-truth branch.
    intr4 = reward_objective(feats, head_w, head_b, baseline)
    ref4 = reward_objective_ref(feats, head_w, head_b, baseline)
    assert jnp.allclose(intr4, ref4, atol=1e-4, rtol=1e-4)

    jax.block_until_ready((intr2, intr3, intr4))
    print("KERNEL_OK")
</pallas_src>

<mosaic_0001>
module attributes {stable_mosaic.version = 11 : i64} {
  func.func @_reward_err_kernel(%arg0: i32, %arg1: memref<16x32xf32, #tpu.memory_space<vmem>>, %arg2: memref<32x1xf32, #tpu.memory_space<vmem>>, %arg3: memref<1xf32, #tpu.memory_space<smem>>, %arg4: memref<16x1xf32, #tpu.memory_space<vmem>>, %arg5: memref<1xf32, #tpu.memory_space<smem>>, %arg6: memref<16x1xf32, #tpu.memory_space<vmem>>, %arg7: memref<1xf32, #tpu.memory_space<smem>>, %arg8: memref<1xf32, #tpu.memory_space<smem>>) attributes {dimension_semantics = [#tpu.dimension_semantics<arbitrary>], iteration_bounds = array<i64: 1>, scalar_prefetch = 0 : i64, scratch_operands = 1 : i64, tpu.core_type = #tpu.core_type<tc>, window_params = [{transform_indices = @transform_0, window_bounds = array<i64: 16, 32>}, {pipeline_mode = #tpu.pipeline_mode<synchronous>, transform_indices = @transform_1, window_bounds = array<i64: 32, 1>}, {transform_indices = @transform_2, window_bounds = array<i64: 1>}, {transform_indices = @transform_3, window_bounds = array<i64: 16, 1>}, {transform_indices = @transform_4, window_bounds = array<i64: 1>}, {transform_indices = @transform_5, window_bounds = array<i64: 16, 1>}, {transform_indices = @transform_6, window_bounds = array<i64: 1>}]} {
    %c0_i32 = arith.constant 0 : i32
    %0 = arith.cmpi eq, %arg0, %c0_i32 : i32
    %1 = arith.extui %0 : i1 to i32
    %c0_i32_0 = arith.constant 0 : i32
    %2 = arith.cmpi ne, %1, %c0_i32_0 : i32
    scf.if %2 {
      %cst_20 = arith.constant 0.000000e+00 : f32
      %c0_21 = arith.constant 0 : index
      %34 = memref.load %arg8[%c0_21] : memref<1xf32, #tpu.memory_space<smem>>
      memref.store %cst_20, %arg8[%c0_21] : memref<1xf32, #tpu.memory_space<smem>>
    } else {
    }
    %c0 = arith.constant 0 : index
    %c0_1 = arith.constant 0 : index
    %3 = vector.load %arg1[%c0, %c0_1] : memref<16x32xf32, #tpu.memory_space<vmem>>, vector<16x32xf32>
    %c0_2 = arith.constant 0 : index
    %c0_3 = arith.constant 0 : index
    %4 = vector.load %arg2[%c0_2, %c0_3] : memref<32x1xf32, #tpu.memory_space<vmem>>, vector<32x1xf32>
    %cst = arith.constant dense<0.000000e+00> : vector<16x1xf32>
    %5 = tpu.matmul %3, %4, %cst {dimension_numbers = #tpu.dot_dimension_numbers<[1], [0], [0], [1], [0, 0, 1, 1], [], []>} : vector<16x32xf32>, vector<32x1xf32>, vector<16x1xf32> -> vector<16x1xf32>
    %c0_4 = arith.constant 0 : index
    %6 = memref.load %arg3[%c0_4] : memref<1xf32, #tpu.memory_space<smem>>
    %7 = vector.broadcast %6 : f32 to vector<16x1xf32>
    %8 = arith.addf %5, %7 : vector<16x1xf32>
    %c0_5 = arith.constant 0 : index
    %c0_6 = arith.constant 0 : index
    %9 = vector.load %arg4[%c0_5, %c0_6] : memref<16x1xf32, #tpu.memory_space<vmem>>, vector<16x1xf32>
    %10 = arith.subf %8, %9 : vector<16x1xf32>
    %c0_7 = arith.constant 0 : index
    %c0_8 = arith.constant 0 : index
    %11 = vector.load %arg6[%c0_7, %c0_8] : memref<16x1xf32, #tpu.memory_space<vmem>>, vector<16x1xf32>
    tpu.vector_store %arg6[%c0_7, %c0_8], %10 {strides = array<i32>} : memref<16x1xf32, #tpu.memory_space<vmem>>, vector<16x1xf32>,
    %c16_i32 = arith.constant 16 : i32
    %12 = arith.muli %arg0, %c16_i32 : i32
    %13 = tpu.iota {dimensions = array<i32: 0>} : vector<16x1xi32>
    %14 = vector.broadcast %12 : i32 to vector<16x1xi32>
    %15 = arith.addi %14, %13 : vector<16x1xi32>
    %c0_9 = arith.constant 0 : index
    %16 = memref.load %arg8[%c0_9] : memref<1xf32, #tpu.memory_space<smem>>
    %c16_i32_10 = arith.constant 16 : i32
    %17 = vector.broadcast %c16_i32_10 : i32 to vector<16x1xi32>
    %18 = arith.cmpi slt, %15, %17 : vector<16x1xi32>
    %cst_11 = arith.constant 0.000000e+00 : f32
    %19 = vector.broadcast %cst_11 : f32 to vector<16x1xf32>
    %20 = arith.select %18, %10, %19 : vector<16x1xi1>, vector<16x1xf32>
    %21 = vector.shape_cast %20 : vector<16x1xf32> to vector<1x16x1xf32>
    %cst_12 = arith.constant dense<0.000000e+00> : vector<1xf32>
    %22 = vector.multi_reduction <add>, %21, %cst_12 [1, 2] : vector<1x16x1xf32> to vector<1xf32>
    %23 = vector.shape_cast %22 : vector<1xf32> to vector<1x1x1xf32>
    %24 = vector.extract %23[0, 0, 0] : f32 from vector<1x1x1xf32>
    %25 = arith.addf %16, %24 : f32
    %c0_13 = arith.constant 0 : index
    %26 = memref.load %arg8[%c0_13] : memref<1xf32, #tpu.memory_space<smem>>
    memref.store %25, %arg8[%c0_13] : memref<1xf32, #tpu.memory_space<smem>>
    %c0_14 = arith.constant 0 : index
    %27 = memref.load %arg8[%c0_14] : memref<1xf32, #tpu.memory_space<smem>>
    %cst_15 = arith.constant 1.600000e+01 : f32
    %28 = arith.divf %27, %cst_15 : f32
    %cst_16 = arith.constant 0.00999999977 : f32
    %29 = arith.mulf %cst_16, %28 : f32
    %c0_17 = arith.constant 0 : index
    %30 = memref.load %arg5[%c0_17] : memref<1xf32, #tpu.memory_space<smem>>
    %cst_18 = arith.constant 9.900000e-01 : f32
    %31 = arith.mulf %cst_18, %30 : f32
    %32 = arith.addf %29, %31 : f32
    %c0_19 = arith.constant 0 : index
    %33 = memref.load %arg7[%c0_19] : memref<1xf32, #tpu.memory_space<smem>>
    memref.store %32, %arg7[%c0_19] : memref<1xf32, #tpu.memory_space<smem>>
    return
  }
  func.func @transform_0(%arg0: i32) -> (i32, i32) {
    %c0_i32 = arith.constant 0 : i32
    %c0_i32_0 = arith.constant 0 : i32
    return %arg0, %c0_i32 : i32, i32
  }
  func.func @transform_1(%arg0: i32) -> (i32, i32) {
    %c0_i32 = arith.constant 0 : i32
    %c0_i32_0 = arith.constant 0 : i32
    %c0_i32_1 = arith.constant 0 : i32
    return %c0_i32, %c0_i32_0 : i32, i32
  }
  func.func @transform_2(%arg0: i32) -> i32 {
    %c0_i32 = arith.constant 0 : i32
    %c0_i32_0 = arith.constant 0 : i32
    return %c0_i32 : i32
  }
  func.func @transform_3(%arg0: i32) -> (i32, i32) {
    %c0_i32 = arith.constant 0 : i32
    %c0_i32_0 = arith.constant 0 : i32
    return %arg0, %c0_i32 : i32, i32
  }
  func.func @transform_4(%arg0: i32) -> i32 {
    %c0_i32 = arith.constant 0 : i32
    %c0_i32_0 = arith.constant 0 : i32
    return %c0_i32 : i32
  }
  func.func @transform_5(%arg0: i32) -> (i32, i32) {
    %c0_i32 = arith.constant 0 : i32
    %c0_i32_0 = arith.constant 0 : i32
    return %arg0, %c0_i32 : i32, i32
  }
  func.func @transform_6(%arg0: i32) -> i32 {
    %c0_i32 = arith.constant 0 : i32
    %c0_i32_0 = arith.constant 0 : i32
    return %c0_i32 : i32
  }
}

</mosaic_0001>

<bundles_post_ra>
// kernel: tpu_custom_call.1
= control target key start
LH: loop header
LB: loop body
LE: loop exit
PB: predicated region body
PF: predicated region fallthrough
CT: control target
= control target key end

     0   :  { %vm39_vm0 = vcmask 261120   ;;  %s289_s0 = inlined_call_operand.vmem [shape: f32[16,32], index: 0, kind: input, shape index: {}]   ;;  %s290_s1 = inlined_call_operand.vmem [shape: f32[32,1], index: 1, kind: input, shape index: {}]   ;;  %s291_s2 = inlined_call_operand.<no memory space> [shape: f32[1], index: 2, kind: input, shape index: {}]   ;;  %s292_s3 = inlined_call_operand.vmem [shape: f32[16,1], index: 3, kind: input, shape index: {}]   ;;  %s293_s4 = inlined_call_operand.<no memory space> [shape: f32[1], index: 4, kind: input, shape index: {}]   ;;  %s294_s5 = inlined_call_operand.vmem [shape: f32[16,1], index: 5, kind: output, shape index: {0}]   ;;  %s295_s6 = inlined_call_operand.hbm [shape: f32[1], index: 6, kind: output, shape index: {1}]  }
   0x1   :  { %v36_v0 = vld [vmem:[%s290_s1 + $0x18] sm:$0xff]  ;;  %v35_v1 = vld [vmem:[%s290_s1 + $0x10] sm:$0xff]  ;;  %v31_v2 = vld [vmem:[%s289_s0] sm:$0xff] }
   0x2   :  { %190 = vmatprep.subr.mxu0 %v36_v0  ;;  %v34_v3 = vld [vmem:[%s290_s1 + $0x8] sm:$0xff]  ;;  %198 = vmatprep.mubr.msk.f32.mxu0 %vm39_vm0, %v31_v2 }
   0x3   :  { %191 = vmatpush3.msra.mxu0 %v36_v0 }
   0x4   :  { %14 = vsyncpa [#allocation6], 0  ;;  %192 = vmatprep.subr.mxu0 %v35_v1  ;;  %v33_v4 = vld [vmem:[%s290_s1] sm:$0xff]  ;;  %v32_v5 = vld [vmem:[%s289_s0 + $0x8] sm:$0xff]  ;;  %v38_v6 = vstv %s291_s2  ;;  %vm125_vm1 = vcmask 7168   ;;  %s214_s21 = smov [#allocation5]  }
   0x5   :  { %193 = vmatpush3.msra.mxu0 %v35_v1  ;;  %v122_v8 = vld [vmem:[%s292_s3 + $0x8] sm:$0xff]  ;;  %v121_v11 = vld [vmem:[%s292_s3] sm:$0xff]  ;;  %s161_s18 = smul.f32 0.99, %s293_s4 }
   0x6   :  { %194 = vmatprep.subr.mxu0 %v34_v3 }
   0x7   :  { %195 = vmatpush3.msra.mxu0 %v34_v3 }
   0x8   :  { %196 = vmatprep.subr.mxu0 %v33_v4 }
   0x9   :  { %197 = vmatpush3.msra.mxu0 %v33_v4 }
   0xa   :  { %199 = vmatmul.mubr.msk.f32.vlgmr.msra.gmra.mxu0 %vm39_vm0, %v32_v5 }
  0xca   :  { %v200_v7 = vpop.f32.mrf.mxu0 }
  0xcb   :  { %v118_v9 = vadd.f32 %v200_v7, %v38_v6 }
  0xcc   :  { %v112_v10 = vpop.f32.mrf.mxu0 }
  0xcd   :  { %v124_v12 = vsub.f32 %v118_v9, %v122_v8  ;;  %v113_v13 = vadd.f32 %v112_v10, %v38_v6 }
  0xcf   :  { %127 = vst.msk [vmem:[%s294_s5 + $0x8] sm:$0xff] %vm125_vm1, %v124_v12  ;;  %v123_v14 = vsub.f32 %v113_v13, %v121_v11  ;;  %v141_v16 = vsel %vm125_vm1, %v124_v12, 0.0 }
  0xd1   :  { %126 = vst.msk [vmem:[%s294_s5] sm:$0xff] %vm125_vm1, %v123_v14  ;;  %v140_v15 = vsel %vm125_vm1, %v123_v14, 0.0 }
  0xd2   :  { %v142_v17 = vadd.f32 %v141_v16, %v140_v15 }
  0xd4   :  { %143 = vadd.xlane.f32.xlu0 %v142_v17 }
 0x15d   :  { %v144_v18 = vpop.xlane.xlu0 %143 }
 0x15e   :  { %v145_v19 = vrot.slane %v144_v18, 4 }
 0x160   :  { %v146_v20 = vadd.f32 %v145_v19, %v144_v18 }
 0x162   :  { %v147_v21 = vrot.slane %v146_v20, 2 }
 0x164   :  { %v148_v22 = vadd.f32 %v147_v21, %v146_v20 }
 0x166   :  { %v149_v23 = vrot.slane %v148_v22, 1 }
 0x168   :  { %v150_v24 = vadd.f32 %v149_v23, %v148_v22 }
 0x16a   :  { %201 = vpush %v150_v24 }
 0x19b   :  { %s202_s3 = spop %201 }
 0x19c   :  { %s158_s19 = smul.f32 0.0625, %s202_s3 }
 0x19e   :  { %s159_s20 = smul.f32 0.01, %s158_s19 }
 0x1a0   :  { %s162_s5 = sadd.f32 %s161_s18, %s159_s20 }
 0x1a2   :  { %164 = sst [smem:[#allocation5]] %s162_s5 }
 0x1a3   :  { %174 = dma.smem_to_hbm %s214_s21, 16, %s295_s6, [#allocation6]  }
 0x1a4   :  { %212 = dma.done.wait [#allocation6], 16  }
 0x1a5   :  { %213 = vsyncadd [#allocation6], 4294967280 }
 0x1a6   :  { %180 = sfence }
 0x1a7   :  { %181 = vsyncpa [#allocation6], 1 }

</bundles_post_ra>
